<compile_context>
chip_gen: v7x
topology: tpu7x:2x2x1
jax: 0.10.0
libtpu: 0.0.40
codegen_flags: <defaults>
</compile_context>

<pallas_src>
import functools

import jax
import jax.numpy as jnp
from jax.experimental import pallas as pl
from jax.experimental.pallas import tpu as pltpu


def _copy_kernel(x_ref, o_ref):
    """Lane-dense pass-through: the f1 channel-slab extraction is done by the
    input BlockSpec, so the body is a pure vld/vst stream the pipeliner overlaps."""
    # x_ref: (1, TH, W, rc)   o_ref: (1, TH, 1, W, rc)
    o_ref[0, :, 0, :, :] = x_ref[0]


def _slab_kernel(x_ref, o_ref, *, r: int, rc: int):
    """Full-C block; tiny static loop peels the r factor-row slabs off the lane
    axis.  Used when rc < 128 (keeps the HBM DMAs C-wide and contiguous)."""
    # x_ref: (1, TH, W, C)    o_ref: (1, TH, r, W, rc)
    for f1 in range(r):
        o_ref[0, :, f1, :, :] = x_ref[0, :, :, f1 * rc:(f1 + 1) * rc]


def _pick_tile_h(h: int, row_bytes: int, target_bytes: int = 1 << 20) -> int:
    """Largest divisor of h whose input block is <= target_bytes (>= 1 row).
    ~0.5-2 MiB blocks reach >=85% of HBM roofline while the double-buffered
    in/out blocks (~4x block bytes) stay well inside v5e's 16 MiB scoped VMEM."""
    best = 1
    for th in range(1, h + 1):
        if h % th == 0 and th * row_bytes <= target_bytes:
            best = th
    return best


def shuffle_up_nhwc(x_nhwc: jax.Array, factor: int = 2) -> jax.Array:
    """Transpose-free fast path: (b, h, w, C) -> (b, h*r, w*r, C // r**2)."""
    b, h, w, c = x_nhwc.shape
    r = factor
    assert c % (r * r) == 0, f"C must be a multiple of {r * r}!"
    c_out = c // (r * r)
    rc = r * c_out                      # fused (f2, co) channel group
    itemsize = jnp.dtype(x_nhwc.dtype).itemsize

    th = _pick_tile_h(h, c * w * itemsize)
    n_h = h // th

    cost = pl.CostEstimate(flops=0, transcendentals=0,
                           bytes_accessed=2 * x_nhwc.size * itemsize)

    if rc % 128 == 0:
        # f1 split pushed into grid + BlockSpec: lane-dense, pure pass-through body.
        out5 = pl.pallas_call(
            _copy_kernel,
            out_shape=jax.ShapeDtypeStruct((b, h, r, w, rc), x_nhwc.dtype),
            grid=(b, n_h, r),
            in_specs=[pl.BlockSpec((1, th, w, rc),
                                   lambda bi, hi, f1: (bi, hi, 0, f1))],
            out_specs=pl.BlockSpec((1, th, 1, w, rc),
                                   lambda bi, hi, f1: (bi, hi, f1, 0, 0)),
            compiler_params=pltpu.CompilerParams(
                dimension_semantics=("parallel", "parallel", "parallel")),
            cost_estimate=cost,
        )(x_nhwc)
    else:
        # Narrow-channel case: full-C blocks, static r-iteration lane-slice loop.
        out5 = pl.pallas_call(
            functools.partial(_slab_kernel, r=r, rc=rc),
            out_shape=jax.ShapeDtypeStruct((b, h, r, w, rc), x_nhwc.dtype),
            grid=(b, n_h),
            in_specs=[pl.BlockSpec((1, th, w, c),
                                   lambda bi, hi: (bi, hi, 0, 0))],
            out_specs=pl.BlockSpec((1, th, r, w, rc),
                                   lambda bi, hi: (bi, hi, 0, 0, 0)),
            compiler_params=pltpu.CompilerParams(
                dimension_semantics=("parallel", "parallel")),
            cost_estimate=cost,
        )(x_nhwc)

    # (b, h, r, w, r*c_out) -> (b, h*r, w*r, c_out): adjacent-dim merge/split in
    # row-major order -> pure bitcast, no data movement.
    return out5.reshape(b, h * r, w * r, c_out)


def shuffle_up(x: jax.Array, factor: int = 2) -> jax.Array:
    """PyTorch-parity API: NCHW in, NCHW out (matches ShuffleUp.forward).
    The two boundary transposes only adapt the channels-first PyTorch layout;
    inside an NHWC TPU pipeline use shuffle_up_nhwc and skip them entirely."""
    x_nhwc = jnp.transpose(x, (0, 2, 3, 1))
    out_nhwc = shuffle_up_nhwc(x_nhwc, factor)
    return jnp.transpose(out_nhwc, (0, 3, 1, 2))


def shuffle_up_reference(x: jax.Array, factor: int) -> jax.Array:
    """Pure-JAX transcription of the PyTorch forward (NCHW)."""
    b, c, h, w = x.shape
    c_out = c // (factor ** 2)
    n = x.reshape(b, factor, factor, c_out, h, w)
    n = jnp.transpose(n, (0, 3, 4, 1, 5, 2))
    return n.reshape(b, c_out, factor * h, factor * w)


if __name__ == "__main__":
    factor = 2

    # Small PyTorch-like shape (exercises the narrow-channel slab-loop path).
    b, c, h, w = 2, 4, 16, 16
    x = jax.random.normal(jax.random.PRNGKey(0), (b, c, h, w), dtype=jnp.float32)
    out = jax.block_until_ready(shuffle_up(x, factor=factor))
    ref = shuffle_up_reference(x, factor)
    assert out.shape == (b, c // factor ** 2, factor * h, factor * w), out.shape
    assert out.dtype == x.dtype
    assert bool(jnp.array_equal(out, ref)), "Pallas output != reference (slab path)"

    # Wider channel count exercises the lane-dense pass-through path (rc % 128 == 0).
    b2, c2, h2, w2 = 1, 256, 16, 16
    x2 = jax.random.normal(jax.random.PRNGKey(0), (b2, c2, h2, w2), dtype=jnp.float32)
    out2 = jax.block_until_ready(shuffle_up(x2, factor=factor))
    ref2 = shuffle_up_reference(x2, factor)
    assert bool(jnp.array_equal(out2, ref2)), "Pallas output != reference (split path)"

    print("KERNEL_OK")
</pallas_src>

<mosaic_0001>
module attributes {stable_mosaic.version = 11 : i64} {
  func.func @_slab_kernel(%arg0: i32, %arg1: i32, %arg2: memref<1x16x16x4xf32, #tpu.memory_space<vmem>>, %arg3: memref<1x16x2x16x2xf32, #tpu.memory_space<vmem>>) attributes {dimension_semantics = [#tpu.dimension_semantics<parallel>, #tpu.dimension_semantics<parallel>], iteration_bounds = array<i64: 2, 1>, scalar_prefetch = 0 : i64, scratch_operands = 0 : i64, tpu.core_type = #tpu.core_type<tc>, window_params = [{transform_indices = @transform_0, window_bounds = array<i64: 1, 16, 16, 4>}, {transform_indices = @transform_1, window_bounds = array<i64: 1, 16, 2, 16, 2>}]} {
    %c0 = arith.constant 0 : index
    %c0_0 = arith.constant 0 : index
    %c0_1 = arith.constant 0 : index
    %c0_2 = arith.constant 0 : index
    %0 = vector.load %arg2[%c0, %c0_0, %c0_1, %c0_2] : memref<1x16x16x4xf32, #tpu.memory_space<vmem>>, vector<1x16x16x2xf32>
    %1 = vector.shape_cast %0 : vector<1x16x16x2xf32> to vector<16x16x2xf32>
    %c0_3 = arith.constant 0 : index
    %c0_4 = arith.constant 0 : index
    %c0_5 = arith.constant 0 : index
    %c0_6 = arith.constant 0 : index
    %c0_7 = arith.constant 0 : index
    %2 = vector.load %arg3[%c0_3, %c0_4, %c0_5, %c0_6, %c0_7] : memref<1x16x2x16x2xf32, #tpu.memory_space<vmem>>, vector<1x16x1x16x2xf32>
    %3 = vector.shape_cast %2 : vector<1x16x1x16x2xf32> to vector<16x16x2xf32>
    %4 = vector.shape_cast %1 : vector<16x16x2xf32> to vector<1x16x1x16x2xf32>
    tpu.vector_store %arg3[%c0_3, %c0_4, %c0_5, %c0_6, %c0_7], %4 {strides = array<i32>} : memref<1x16x2x16x2xf32, #tpu.memory_space<vmem>>, vector<1x16x1x16x2xf32>,
    %c0_8 = arith.constant 0 : index
    %c0_9 = arith.constant 0 : index
    %c0_10 = arith.constant 0 : index
    %c2 = arith.constant 2 : index
    %5 = vector.load %arg2[%c0_8, %c0_9, %c0_10, %c2] : memref<1x16x16x4xf32, #tpu.memory_space<vmem>>, vector<1x16x16x2xf32>
    %6 = vector.shape_cast %5 : vector<1x16x16x2xf32> to vector<16x16x2xf32>
    %c0_11 = arith.constant 0 : index
    %c0_12 = arith.constant 0 : index
    %c1 = arith.constant 1 : index
    %c0_13 = arith.constant 0 : index
    %c0_14 = arith.constant 0 : index
    %7 = vector.load %arg3[%c0_11, %c0_12, %c1, %c0_13, %c0_14] : memref<1x16x2x16x2xf32, #tpu.memory_space<vmem>>, vector<1x16x1x16x2xf32>
    %8 = vector.shape_cast %7 : vector<1x16x1x16x2xf32> to vector<16x16x2xf32>
    %9 = vector.shape_cast %6 : vector<16x16x2xf32> to vector<1x16x1x16x2xf32>
    tpu.vector_store %arg3[%c0_11, %c0_12, %c1, %c0_13, %c0_14], %9 {strides = array<i32>} : memref<1x16x2x16x2xf32, #tpu.memory_space<vmem>>, vector<1x16x1x16x2xf32>,
    return
  }
  func.func @transform_0(%arg0: i32, %arg1: i32) -> (i32, i32, i32, i32) {
    %c0_i32 = arith.constant 0 : i32
    %c0_i32_0 = arith.constant 0 : i32
    %c0_i32_1 = arith.constant 0 : i32
    return %arg0, %arg1, %c0_i32, %c0_i32_0 : i32, i32, i32, i32
  }
  func.func @transform_1(%arg0: i32, %arg1: i32) -> (i32, i32, i32, i32, i32) {
    %c0_i32 = arith.constant 0 : i32
    %c0_i32_0 = arith.constant 0 : i32
    %c0_i32_1 = arith.constant 0 : i32
    %c0_i32_2 = arith.constant 0 : i32
    return %arg0, %arg1, %c0_i32, %c0_i32_0, %c0_i32_1 : i32, i32, i32, i32, i32
  }
}

</mosaic_0001>

<bundles_post_ra>
// kernel: tpu_custom_call.1
= control target key start
LH: loop header
LB: loop body
LE: loop exit
PB: predicated region body
PF: predicated region fallthrough
CT: control target
= control target key end

     0   :  { %s620_s6 = smov 0   ;;  %s622_s7 = smov 0   ;;  %s849_s0 = inlined_call_operand.vmem [shape: f32[2,16,16,4], index: 0, kind: input, shape index: {}]   ;;  %s850_s1 = inlined_call_operand.vmem [shape: f32[2,16,2,16,2], index: 1, kind: output, shape index: {}]  }
   0x1   :  { %s624_s8 = smov 0  }
   0x2 LB: > { %s23_s9 = sadd.s32 1, %s603_s7  ;;  %p519_p0 = scmp.ge.s32.totalorder %s607_s8, 1  ;;  %s607_s8 = sphi %s624_s8, %s11_s8   ;;  %s603_s7 = sphi %s622_s7, %s852_s7   ;;  %s599_s6 = sphi %s620_s6, %s851_s6  }
   0x3   : > { %p25_p1 = scmp.ge.s32.totalorder %s23_s9, 2  ;;  %p109_p2 = scmp.lt.s32.totalorder %s607_s8, 3 }
   0x5   : > { %s854_s9 = smov (%p25_p1, %s23_s9), 0  ;;  %p110_p3 = pnand %p519_p0, %p109_p2 }
   0x6   : > { %p140_p4 = scmp.lt.s32.totalorder (!%p110_p3), %s599_s6, 1  ;;  %vm193_vm0 = vcmask (!%p110_p3), 15360   ;;  %s609_s18 = smov (!%p110_p3), 126  }
   0x7   : > { %113 = sbr.rel (%p110_p3) target bundleno = 198 (0xc6), region = 24 }
   0xe   : > { %s856_s6 = smov (!%p140_p4, %s599_s6), 1 }
   0xf   : > { %s558_s10 = sshll.u32 %s856_s6, 8  ;;  %s559_s11 = sshll.u32 %s856_s6, 9 }
  0x10   : > { %s641_s14 = scalar_lea.vmem %s849_s0, %s558_s10  ;;  %s649_s17 = scalar_lea.vmem %s850_s1, %s559_s11 }
  0x11   : > { %v228_v0 = vld [vmem:[%s641_s14 + $0x10] sm:$0xff]  ;;  %v226_v1 = vld [vmem:[%s641_s14] sm:$0xff]  ;;  %v229_v2 = vld [vmem:[%s641_s14 + $0x18] sm:$0xff] }
  0x12   : > { %294 = vrot.lane.b32.xlu1 %v228_v0, %s609_s18  ;;  %290 = vrot.lane.b32.xlu0 %v226_v1, %s609_s18  ;;  %v227_v3 = vld [vmem:[%s641_s14 + $0x8] sm:$0xff]  ;;  %194 = vst.msk [vmem:[%s649_s17] sm:$0xff] %vm193_vm0, %v226_v1 }
  0x13   : > { %v231_v4 = vld [vmem:[%s641_s14 + $0x28] sm:$0xff]  ;;  %196 = vst.msk [vmem:[%s649_s17 + $0x20] sm:$0xff] %vm193_vm0, %v228_v0  ;;  %197 = vst.msk [vmem:[%s649_s17 + $0x28] sm:$0xff] %vm193_vm0, %v229_v2  ;;  %v230_v5 = vld [vmem:[%s641_s14 + $0x20] sm:$0xff] }
  0x14   : > { %v233_v6 = vld [vmem:[%s641_s14 + $0x38] sm:$0xff]  ;;  %v232_v7 = vld [vmem:[%s641_s14 + $0x30] sm:$0xff]  ;;  %195 = vst.msk [vmem:[%s649_s17 + $0x8] sm:$0xff] %vm193_vm0, %v227_v3  ;;  %199 = vst.msk [vmem:[%s649_s17 + $0x48] sm:$0xff] %vm193_vm0, %v231_v4 }
  0x15   : > { %v235_v8 = vld [vmem:[%s641_s14 + $0x48] sm:$0xff]  ;;  %v234_v9 = vld [vmem:[%s641_s14 + $0x40] sm:$0xff]  ;;  %v237_v10 = vld [vmem:[%s641_s14 + $0x58] sm:$0xff]  ;;  %198 = vst.msk [vmem:[%s649_s17 + $0x40] sm:$0xff] %vm193_vm0, %v230_v5 }
  0x16   : > { %200 = vst.msk [vmem:[%s649_s17 + $0x60] sm:$0xff] %vm193_vm0, %v232_v7  ;;  %201 = vst.msk [vmem:[%s649_s17 + $0x68] sm:$0xff] %vm193_vm0, %v233_v6  ;;  %v236_v11 = vld [vmem:[%s641_s14 + $0x50] sm:$0xff]  ;;  %v239_v12 = vld [vmem:[%s641_s14 + $0x68] sm:$0xff] }
  0x17   : > { %v238_v13 = vld [vmem:[%s641_s14 + $0x60] sm:$0xff]  ;;  %202 = vst.msk [vmem:[%s649_s17 + $0x80] sm:$0xff] %vm193_vm0, %v234_v9  ;;  %203 = vst.msk [vmem:[%s649_s17 + $0x88] sm:$0xff] %vm193_vm0, %v235_v8  ;;  %296 = vrot.lane.b32.xlu1 %v229_v2, %s609_s18 }
  0x18   : > { %205 = vst.msk [vmem:[%s649_s17 + $0xa8] sm:$0xff] %vm193_vm0, %v237_v10  ;;  %292 = vrot.lane.b32.xlu0 %v227_v3, %s609_s18  ;;  %v241_v14 = vld [vmem:[%s641_s14 + $0x78] sm:$0xff]  ;;  %v240_v15 = vld [vmem:[%s641_s14 + $0x70] sm:$0xff] }
  0x19   : > { %204 = vst.msk [vmem:[%s649_s17 + $0xa0] sm:$0xff] %vm193_vm0, %v236_v11  ;;  %206 = vst.msk [vmem:[%s649_s17 + $0xc0] sm:$0xff] %vm193_vm0, %v238_v13  ;;  %v243_v16 = vld [vmem:[%s641_s14 + $0x88] sm:$0xff]  ;;  %v242_v17 = vld [vmem:[%s641_s14 + $0x80] sm:$0xff] }
  0x1a   : > { %207 = vst.msk [vmem:[%s649_s17 + $0xc8] sm:$0xff] %vm193_vm0, %v239_v12  ;;  %v245_v18 = vld [vmem:[%s641_s14 + $0x98] sm:$0xff]  ;;  %208 = vst.msk [vmem:[%s649_s17 + $0xe0] sm:$0xff] %vm193_vm0, %v240_v15  ;;  %v244_v19 = vld [vmem:[%s641_s14 + $0x90] sm:$0xff] }
  0x1b   : > { %209 = vst.msk [vmem:[%s649_s17 + $0xe8] sm:$0xff] %vm193_vm0, %v241_v14  ;;  %v247_v20 = vld [vmem:[%s641_s14 + $0xa8] sm:$0xff]  ;;  %v246_v21 = vld [vmem:[%s641_s14 + $0xa0] sm:$0xff]  ;;  %210 = vst.msk [vmem:[%s649_s17 + $0x100] sm:$0xff] %vm193_vm0, %v242_v17 }
  0x1c   : > { %211 = vst.msk [vmem:[%s649_s17 + $0x108] sm:$0xff] %vm193_vm0, %v243_v16  ;;  %213 = vst.msk [vmem:[%s649_s17 + $0x128] sm:$0xff] %vm193_vm0, %v245_v18  ;;  %v249_v22 = vld [vmem:[%s641_s14 + $0xb8] sm:$0xff]  ;;  %v248_v23 = vld [vmem:[%s641_s14 + $0xb0] sm:$0xff] }
  0x1d   : > { %v251_v24 = vld [vmem:[%s641_s14 + $0xc8] sm:$0xff]  ;;  %212 = vst.msk [vmem:[%s649_s17 + $0x120] sm:$0xff] %vm193_vm0, %v244_v19  ;;  %214 = vst.msk [vmem:[%s649_s17 + $0x140] sm:$0xff] %vm193_vm0, %v246_v21  ;;  %300 = vrot.lane.b32.xlu1 %v231_v4, %s609_s18 }
  0x1e   : > { %215 = vst.msk [vmem:[%s649_s17 + $0x148] sm:$0xff] %vm193_vm0, %v247_v20  ;;  %298 = vrot.lane.b32.xlu0 %v230_v5, %s609_s18  ;;  %v250_v25 = vld [vmem:[%s641_s14 + $0xc0] sm:$0xff]  ;;  %v253_v26 = vld [vmem:[%s641_s14 + $0xd8] sm:$0xff] }
  0x1f   : > { %216 = vst.msk [vmem:[%s649_s17 + $0x160] sm:$0xff] %vm193_vm0, %v248_v23  ;;  %217 = vst.msk [vmem:[%s649_s17 + $0x168] sm:$0xff] %vm193_vm0, %v249_v22  ;;  %v252_v27 = vld [vmem:[%s641_s14 + $0xd0] sm:$0xff]  ;;  %v255_v28 = vld [vmem:[%s641_s14 + $0xe8] sm:$0xff] }
  0x20   : > { %219 = vst.msk [vmem:[%s649_s17 + $0x188] sm:$0xff] %vm193_vm0, %v251_v24  ;;  %v254_v29 = vld [vmem:[%s641_s14 + $0xe0] sm:$0xff]  ;;  %218 = vst.msk [vmem:[%s649_s17 + $0x180] sm:$0xff] %vm193_vm0, %v250_v25  ;;  %v257_v30 = vld [vmem:[%s641_s14 + $0xf8] sm:$0xff] }
  0x21   : > { %221 = vst.msk [vmem:[%s649_s17 + $0x1a8] sm:$0xff] %vm193_vm0, %v253_v26  ;;  %v256_v31 = vld [vmem:[%s641_s14 + $0xf0] sm:$0xff]  ;;  %220 = vst.msk [vmem:[%s649_s17 + $0x1a0] sm:$0xff] %vm193_vm0, %v252_v27  ;;  %304 = vrot.lane.b32.xlu1 %v233_v6, %s609_s18 }
  0x22   : > { %222 = vst.msk [vmem:[%s649_s17 + $0x1c0] sm:$0xff] %vm193_vm0, %v254_v29  ;;  %223 = vst.msk [vmem:[%s649_s17 + $0x1c8] sm:$0xff] %vm193_vm0, %v255_v28  ;;  %302 = vrot.lane.b32.xlu0 %v232_v7, %s609_s18 }
  0x23   : > { %224 = vst.msk [vmem:[%s649_s17 + $0x1e0] sm:$0xff] %vm193_vm0, %v256_v31  ;;  %225 = vst.msk [vmem:[%s649_s17 + $0x1e8] sm:$0xff] %vm193_vm0, %v257_v30 }
  0x25   : > { %308 = vrot.lane.b32.xlu1 %v235_v8, %s609_s18 }
  0x26   : > { %306 = vrot.lane.b32.xlu0 %v234_v9, %s609_s18 }
  0x29   : > { %312 = vrot.lane.b32.xlu1 %v237_v10, %s609_s18 }
  0x2a   : > { %310 = vrot.lane.b32.xlu0 %v236_v11, %s609_s18 }
  0x2d   : > { %316 = vrot.lane.b32.xlu1 %v239_v12, %s609_s18 }
  0x2e   : > { %314 = vrot.lane.b32.xlu0 %v238_v13, %s609_s18 }
  0x31   : > { %320 = vrot.lane.b32.xlu1 %v241_v14, %s609_s18 }
  0x32   : > { %318 = vrot.lane.b32.xlu0 %v240_v15, %s609_s18 }
  0x35   : > { %324 = vrot.lane.b32.xlu1 %v243_v16, %s609_s18 }
  0x36   : > { %322 = vrot.lane.b32.xlu0 %v242_v17, %s609_s18 }
  0x39   : > { %328 = vrot.lane.b32.xlu1 %v245_v18, %s609_s18 }
  0x3a   : > { %326 = vrot.lane.b32.xlu0 %v244_v19, %s609_s18 }
  0x3d   : > { %332 = vrot.lane.b32.xlu1 %v247_v20, %s609_s18 }
  0x3e   : > { %330 = vrot.lane.b32.xlu0 %v246_v21, %s609_s18 }
  0x41   : > { %336 = vrot.lane.b32.xlu1 %v249_v22, %s609_s18 }
  0x42   : > { %334 = vrot.lane.b32.xlu0 %v248_v23, %s609_s18 }
  0x45   : > { %340 = vrot.lane.b32.xlu1 %v251_v24, %s609_s18 }
  0x46   : > { %338 = vrot.lane.b32.xlu0 %v250_v25, %s609_s18 }
  0x49   : > { %344 = vrot.lane.b32.xlu1 %v253_v26, %s609_s18 }
  0x4a   : > { %342 = vrot.lane.b32.xlu0 %v252_v27, %s609_s18 }
  0x4d   : > { %348 = vrot.lane.b32.xlu1 %v255_v28, %s609_s18 }
  0x4e   : > { %346 = vrot.lane.b32.xlu0 %v254_v29, %s609_s18 }
  0x51   : > { %352 = vrot.lane.b32.xlu1 %v257_v30, %s609_s18 }
  0x52   : > { %350 = vrot.lane.b32.xlu0 %v256_v31, %s609_s18 }
  0x84   : > { %v295_v32 = vpop.permute.xlu1 %294  ;;  %v291_v33 = vpop.permute.xlu0 %290 }
  0x85   : > { %526 = vst.msk [vmem:[%s649_s17 + $0x30] sm:$0xff] %vm193_vm0, %v295_v32  ;;  %524 = vst.msk [vmem:[%s649_s17 + $0x10] sm:$0xff] %vm193_vm0, %v291_v33 }
  0x89   : > { %v297_v34 = vpop.permute.xlu1 %296 }
  0x8a   : > { %v293_v35 = vpop.permute.xlu0 %292  ;;  %527 = vst.msk [vmem:[%s649_s17 + $0x38] sm:$0xff] %vm193_vm0, %v297_v34 }
  0x8b   : > { %525 = vst.msk [vmem:[%s649_s17 + $0x18] sm:$0xff] %vm193_vm0, %v293_v35 }
  0x8f   : > { %v301_v36 = vpop.permute.xlu1 %300 }
  0x90   : > { %v299_v37 = vpop.permute.xlu0 %298  ;;  %529 = vst.msk [vmem:[%s649_s17 + $0x58] sm:$0xff] %vm193_vm0, %v301_v36 }
  0x91   : > { %528 = vst.msk [vmem:[%s649_s17 + $0x50] sm:$0xff] %vm193_vm0, %v299_v37 }
  0x93   : > { %v305_v38 = vpop.permute.xlu1 %304 }
  0x94   : > { %v303_v39 = vpop.permute.xlu0 %302  ;;  %531 = vst.msk [vmem:[%s649_s17 + $0x78] sm:$0xff] %vm193_vm0, %v305_v38 }
  0x95   : > { %530 = vst.msk [vmem:[%s649_s17 + $0x70] sm:$0xff] %vm193_vm0, %v303_v39 }
  0x97   : > { %v309_v40 = vpop.permute.xlu1 %308 }
  0x98   : > { %v307_v41 = vpop.permute.xlu0 %306  ;;  %533 = vst.msk [vmem:[%s649_s17 + $0x98] sm:$0xff] %vm193_vm0, %v309_v40 }
  0x99   : > { %532 = vst.msk [vmem:[%s649_s17 + $0x90] sm:$0xff] %vm193_vm0, %v307_v41 }
  0x9b   : > { %v313_v42 = vpop.permute.xlu1 %312 }
  0x9c   : > { %v311_v43 = vpop.permute.xlu0 %310  ;;  %535 = vst.msk [vmem:[%s649_s17 + $0xb8] sm:$0xff] %vm193_vm0, %v313_v42 }
  0x9d   : > { %534 = vst.msk [vmem:[%s649_s17 + $0xb0] sm:$0xff] %vm193_vm0, %v311_v43 }
  0x9f   : > { %v317_v44 = vpop.permute.xlu1 %316 }
  0xa0   : > { %v315_v45 = vpop.permute.xlu0 %314  ;;  %537 = vst.msk [vmem:[%s649_s17 + $0xd8] sm:$0xff] %vm193_vm0, %v317_v44 }
  0xa1   : > { %536 = vst.msk [vmem:[%s649_s17 + $0xd0] sm:$0xff] %vm193_vm0, %v315_v45 }
  0xa3   : > { %v321_v46 = vpop.permute.xlu1 %320 }
  0xa4   : > { %v319_v47 = vpop.permute.xlu0 %318  ;;  %539 = vst.msk [vmem:[%s649_s17 + $0xf8] sm:$0xff] %vm193_vm0, %v321_v46 }
  0xa5   : > { %538 = vst.msk [vmem:[%s649_s17 + $0xf0] sm:$0xff] %vm193_vm0, %v319_v47 }
  0xa7   : > { %v325_v48 = vpop.permute.xlu1 %324 }
  0xa8   : > { %v323_v49 = vpop.permute.xlu0 %322  ;;  %541 = vst.msk [vmem:[%s649_s17 + $0x118] sm:$0xff] %vm193_vm0, %v325_v48 }
  0xa9   : > { %540 = vst.msk [vmem:[%s649_s17 + $0x110] sm:$0xff] %vm193_vm0, %v323_v49 }
  0xab   : > { %v329_v50 = vpop.permute.xlu1 %328 }
  0xac   : > { %v327_v51 = vpop.permute.xlu0 %326  ;;  %543 = vst.msk [vmem:[%s649_s17 + $0x138] sm:$0xff] %vm193_vm0, %v329_v50 }
  0xad   : > { %542 = vst.msk [vmem:[%s649_s17 + $0x130] sm:$0xff] %vm193_vm0, %v327_v51 }
  0xaf   : > { %v333_v52 = vpop.permute.xlu1 %332 }
  0xb0   : > { %v331_v53 = vpop.permute.xlu0 %330  ;;  %545 = vst.msk [vmem:[%s649_s17 + $0x158] sm:$0xff] %vm193_vm0, %v333_v52 }
  0xb1   : > { %544 = vst.msk [vmem:[%s649_s17 + $0x150] sm:$0xff] %vm193_vm0, %v331_v53 }
  0xb3   : > { %v337_v54 = vpop.permute.xlu1 %336 }
  0xb4   : > { %v335_v55 = vpop.permute.xlu0 %334  ;;  %547 = vst.msk [vmem:[%s649_s17 + $0x178] sm:$0xff] %vm193_vm0, %v337_v54 }
  0xb5   : > { %546 = vst.msk [vmem:[%s649_s17 + $0x170] sm:$0xff] %vm193_vm0, %v335_v55 }
  0xb7   : > { %v341_v56 = vpop.permute.xlu1 %340 }
  0xb8   : > { %v339_v57 = vpop.permute.xlu0 %338  ;;  %549 = vst.msk [vmem:[%s649_s17 + $0x198] sm:$0xff] %vm193_vm0, %v341_v56 }
  0xb9   : > { %548 = vst.msk [vmem:[%s649_s17 + $0x190] sm:$0xff] %vm193_vm0, %v339_v57 }
  0xbb   : > { %v345_v58 = vpop.permute.xlu1 %344 }
  0xbc   : > { %v343_v59 = vpop.permute.xlu0 %342  ;;  %551 = vst.msk [vmem:[%s649_s17 + $0x1b8] sm:$0xff] %vm193_vm0, %v345_v58 }
  0xbd   : > { %550 = vst.msk [vmem:[%s649_s17 + $0x1b0] sm:$0xff] %vm193_vm0, %v343_v59 }
  0xbf   : > { %v349_v60 = vpop.permute.xlu1 %348 }
  0xc0   : > { %v347_v61 = vpop.permute.xlu0 %346  ;;  %553 = vst.msk [vmem:[%s649_s17 + $0x1d8] sm:$0xff] %vm193_vm0, %v349_v60 }
  0xc1   : > { %552 = vst.msk [vmem:[%s649_s17 + $0x1d0] sm:$0xff] %vm193_vm0, %v347_v61 }
  0xc3   : > { %v353_v62 = vpop.permute.xlu1 %352 }
  0xc4   : > { %v351_v63 = vpop.permute.xlu0 %350  ;;  %555 = vst.msk [vmem:[%s649_s17 + $0x1f8] sm:$0xff] %vm193_vm0, %v353_v62 }
  0xc5   : > { %554 = vst.msk [vmem:[%s649_s17 + $0x1f0] sm:$0xff] %vm193_vm0, %v351_v63 }
  0xc6 PF: > { %s11_s8 = sadd.s32 1, %s607_s8   ;;  %s851_s6 = smov %s603_s7 }
  0xc7   : > { %p8_p5 = scmp.ge.s32.totalorder %s11_s8, 4   ;;  %s852_s7 = smov %s854_s9 }
  0xc9   :  { %10 = sbr.rel (!%p8_p5) target bundleno = 2 (0x2), region = 55 }

</bundles_post_ra>
